<compile_context>
chip_gen: v6e
topology: v6e:2x2x1
jax: 0.10.0
libtpu: 0.0.40
codegen_flags: <defaults>
</compile_context>

<pallas_src>
import functools

import jax
import jax.numpy as jnp
from jax.experimental import pallas as pl
from jax.experimental.pallas import tpu as pltpu

HIDDEN = 64          # per-network hidden width (fixed by the PyTorch module)
FUSED = 2 * HIDDEN   # 128 = one vreg of lanes for the fused actor|critic layers
L3_W = 128           # lane-padded fused layer-3 width (actor logits | value)
OUT_W = 8            # narrow output: col0=logp, col1=value, col2=entropy
NEG_BIG = -1e30      # finite "minus infinity" for padded logit lanes (f32 only)


def _round_up(x, m):
    return (x + m - 1) // m * m


def actor_critic_kernel(obs_ref, act_ref,
                        w1_ref, b1_ref, w2_ref, b2_ref, w3_ref, b3_ref,
                        out_ref, *, action_dim):
    dt = w2_ref.dtype                                   # bf16 (fast) or f32 (exact)
    x = obs_ref[...]                                    # (TB, obs_dim)

    # ---- fused actor|critic MLP: every matmul is a full 128-lane MXU pass ----
    # f32 accumulation; tanh runs in the operand dtype (bf16 halves EUP work on
    # v6e/v7x and removes the astype before the next matmul).
    h1 = jnp.tanh((jnp.dot(x, w1_ref[...], preferred_element_type=jnp.float32)
                   + b1_ref[...]).astype(dt))
    h2 = jnp.tanh((jnp.dot(h1, w2_ref[...], preferred_element_type=jnp.float32)
                   + b2_ref[...]).astype(dt))
    out3 = jnp.dot(h2, w3_ref[...],
                   preferred_element_type=jnp.float32) + b3_ref[...]   # (TB,128) f32

    col = jax.lax.broadcasted_iota(jnp.int32, out3.shape, 1)           # (TB,128)
    is_logit = col < action_dim

    # ---- numerically-stable log-softmax over the logit lanes (f32) ----
    logits = jnp.where(is_logit, out3, jnp.float32(NEG_BIG))
    m = jnp.max(logits, axis=-1, keepdims=True)
    z = logits - m
    ez = jnp.exp(z)                                     # padded lanes flush to 0
    denom = jnp.sum(ez, axis=-1, keepdims=True)
    log_denom = jnp.log(denom)
    log_probs = z - log_denom

    # Categorical.log_prob(act): one-hot gather over logit lanes
    act = act_ref[...]                                  # (TB, 1) int32
    logp = jnp.sum(jnp.where(col == act, log_probs, 0.0),
                   axis=-1, keepdims=True)              # (TB, 1)

    # Categorical.entropy(), exact:  H = log(denom) - sum(ez*z)/denom
    s_ez_z = jnp.sum(jnp.where(is_logit, ez * z, 0.0),
                     axis=-1, keepdims=True)
    ent = log_denom - s_ez_z / denom                    # (TB, 1), exact divide

    # critic value lives in lane `action_dim`: static lane slice, no reduce
    val = out3[:, action_dim:action_dim + 1]            # (TB, 1)

    # ---- narrow writeback: col0=logp, col1=val, col2=ent, rest 0 ----
    col8 = jax.lax.broadcasted_iota(jnp.int32, (out3.shape[0], OUT_W), 1)
    out_ref[...] = jnp.where(col8 == 0, logp,
                   jnp.where(col8 == 1, val,
                   jnp.where(col8 == 2, ent, jnp.float32(0.0))))


def fuse_params(p, action_dim, hidden):
    """Build 128-lane-wide fused weights (done once, outside the kernel)."""
    # Layout requirements of the fused layer-3 (value stored in lane action_dim)
    assert hidden == HIDDEN and 2 * hidden == FUSED, "fusion assumes hidden == 64"
    assert action_dim + 1 <= L3_W, "fusion assumes action_dim + 1 <= 128"
    zero = jnp.zeros((hidden, hidden), jnp.float32)
    w1 = jnp.concatenate([p["aw1"], p["cw1"]], axis=1)            # (obs_dim, 128)
    b1 = jnp.concatenate([p["ab1"], p["cb1"]], axis=1)            # (1, 128)
    w2 = jnp.block([[p["aw2"], zero], [zero, p["cw2"]]])          # (128, 128)
    b2 = jnp.concatenate([p["ab2"], p["cb2"]], axis=1)            # (1, 128)
    w3 = jnp.zeros((FUSED, L3_W), jnp.float32)
    w3 = w3.at[:hidden, :action_dim].set(p["aw3"])
    w3 = w3.at[hidden:, action_dim].set(p["cw3"][:, 0])
    b3 = jnp.zeros((1, L3_W), jnp.float32)
    b3 = b3.at[0, :action_dim].set(p["ab3"][0])
    b3 = b3.at[0, action_dim].set(p["cb3"][0, 0])
    return w1, b1, w2, b2, w3, b3


def actor_critic_evaluate(obs, act, params, *, block_b=2048, use_bf16=True):
    """obs: (B, obs_dim) f32, act: (B,) int.
    Returns (action_logprobs (B,), state_values (B,1), dist_entropy (B,))."""
    B, obs_dim = obs.shape
    hidden = params["aw1"].shape[1]
    action_dim = params["aw3"].shape[1]

    w1, b1, w2, b2, w3, b3 = fuse_params(params, action_dim, hidden)

    obs = obs.astype(jnp.float32)
    if use_bf16:  # bf16 MXU operands / tanh; accumulation stays f32
        obs = obs.astype(jnp.bfloat16)
        w1, w2, w3 = (w.astype(jnp.bfloat16) for w in (w1, w2, w3))

    # Batch tiling: big tiles amortize the ~0.35 us/grid-step overhead, but keep
    # >= 2 grid steps when possible so v7x can shard the batch over both TCs.
    # 16-row granularity keeps bf16 sublane tiling legal when the grid has
    # multiple steps.
    tb = min(block_b, _round_up(pl.cdiv(B, 2), 16))
    b_pad = _round_up(B, tb)
    if b_pad != B:
        obs_p = jnp.zeros((b_pad, obs_dim), obs.dtype).at[:B].set(obs)
        act_p = jnp.zeros((b_pad, 1), jnp.int32).at[:B, 0].set(act.astype(jnp.int32))
    else:
        obs_p = obs
        act_p = act.reshape(B, 1).astype(jnp.int32)

    kernel = functools.partial(actor_critic_kernel, action_dim=action_dim)

    out = pl.pallas_call(
        kernel,
        out_shape=jax.ShapeDtypeStruct((b_pad, OUT_W), jnp.float32),
        grid=(b_pad // tb,),
        in_specs=[
            pl.BlockSpec((tb, obs_dim), lambda i: (i, 0)),        # obs tile
            pl.BlockSpec((tb, 1), lambda i: (i, 0)),              # act tile
            # constant index maps => block index never changes, so Pallas keeps
            # the fused weights (~132 KB) resident in VMEM across grid steps.
            pl.BlockSpec(w1.shape, lambda i: (0, 0)),
            pl.BlockSpec(b1.shape, lambda i: (0, 0)),
            pl.BlockSpec(w2.shape, lambda i: (0, 0)),
            pl.BlockSpec(b2.shape, lambda i: (0, 0)),
            pl.BlockSpec(w3.shape, lambda i: (0, 0)),
            pl.BlockSpec(b3.shape, lambda i: (0, 0)),
        ],
        out_specs=pl.BlockSpec((tb, OUT_W), lambda i: (i, 0)),
        compiler_params=pltpu.CompilerParams(
            dimension_semantics=("parallel",)),                   # megacore on v7x
    )(obs_p, act_p, w1, b1, w2, b2, w3, b3)

    logp = out[:B, 0]
    val = out[:B, 1:2]
    ent = out[:B, 2]
    return logp, val, ent


def init_params(key, obs_dim, action_dim, hidden=64):
    ks = jax.random.split(key, 12)
    s = 0.1

    def w(k, shp):
        return jax.random.normal(k, shp, dtype=jnp.float32) * s

    return dict(
        aw1=w(ks[0], (obs_dim, hidden)),    ab1=w(ks[1], (1, hidden)),
        aw2=w(ks[2], (hidden, hidden)),     ab2=w(ks[3], (1, hidden)),
        aw3=w(ks[4], (hidden, action_dim)), ab3=w(ks[5], (1, action_dim)),
        cw1=w(ks[6], (obs_dim, hidden)),    cb1=w(ks[7], (1, hidden)),
        cw2=w(ks[8], (hidden, hidden)),     cb2=w(ks[9], (1, hidden)),
        cw3=w(ks[10], (hidden, 1)),         cb3=w(ks[11], (1, 1)),
    )


def reference_evaluate(obs, act, p):
    h = jnp.tanh(obs @ p["aw1"] + p["ab1"])
    h = jnp.tanh(h @ p["aw2"] + p["ab2"])
    logits = h @ p["aw3"] + p["ab3"]
    logz = logits - jax.scipy.special.logsumexp(logits, axis=-1, keepdims=True)
    probs = jnp.exp(logz)
    logp = jnp.take_along_axis(logz, act[:, None], axis=-1)[:, 0]
    ent = -jnp.sum(probs * logz, axis=-1)
    hc = jnp.tanh(obs @ p["cw1"] + p["cb1"])
    hc = jnp.tanh(hc @ p["cw2"] + p["cb2"])
    val = hc @ p["cw3"] + p["cb3"]
    return logp, val, ent


if __name__ == "__main__":
    OBS_DIM, ACTION_DIM = 16, 8
    key = jax.random.PRNGKey(0)
    k_params, k_obs, k_act, k_obs2, k_act2 = jax.random.split(key, 5)
    params = init_params(k_params, OBS_DIM, ACTION_DIM)

    def check(B, kobs, kact, *, use_bf16, atol_main, atol_ent):
        obs = jax.random.normal(kobs, (B, OBS_DIM), dtype=jnp.float32)
        act = jax.random.randint(kact, (B,), 0, ACTION_DIM, dtype=jnp.int32)
        logp, val, ent = actor_critic_evaluate(obs, act, params, use_bf16=use_bf16)
        jax.block_until_ready((logp, val, ent))
        r_logp, r_val, r_ent = reference_evaluate(obs, act, params)
        assert jnp.allclose(logp, r_logp, atol=atol_main), "logprob mismatch"
        assert jnp.allclose(val, r_val, atol=atol_main), "value mismatch"
        assert jnp.allclose(ent, r_ent, atol=atol_ent), "entropy mismatch"

    # exact f32 path (strict reference check; entropy now exact, no approx recip)
    check(8, k_obs, k_act, use_bf16=False, atol_main=1e-5, atol_ent=1e-4)
    check(300, k_obs2, k_act2, use_bf16=False, atol_main=1e-5, atol_ent=1e-4)
    # default bf16-operand performance path (f32 accumulation) — looser tolerance
    check(8, k_obs, k_act, use_bf16=True, atol_main=3e-2, atol_ent=3e-2)
    check(300, k_obs2, k_act2, use_bf16=True, atol_main=3e-2, atol_ent=3e-2)

    print("KERNEL_OK")
</pallas_src>

<mosaic_0001>
module attributes {stable_mosaic.version = 11 : i64} {
  func.func @actor_critic_kernel(%arg0: i32, %arg1: memref<16x16xf32, #tpu.memory_space<vmem>>, %arg2: memref<16x1xi32, #tpu.memory_space<vmem>>, %arg3: memref<16x128xf32, #tpu.memory_space<vmem>>, %arg4: memref<1x128xf32, #tpu.memory_space<vmem>>, %arg5: memref<128x128xf32, #tpu.memory_space<vmem>>, %arg6: memref<1x128xf32, #tpu.memory_space<vmem>>, %arg7: memref<128x128xf32, #tpu.memory_space<vmem>>, %arg8: memref<1x128xf32, #tpu.memory_space<vmem>>, %arg9: memref<16x8xf32, #tpu.memory_space<vmem>>) attributes {dimension_semantics = [#tpu.dimension_semantics<parallel>], iteration_bounds = array<i64: 1>, scalar_prefetch = 0 : i64, scratch_operands = 0 : i64, tpu.core_type = #tpu.core_type<tc>, window_params = [{transform_indices = @transform_0, window_bounds = array<i64: 16, 16>}, {transform_indices = @transform_1, window_bounds = array<i64: 16, 1>}, {pipeline_mode = #tpu.pipeline_mode<synchronous>, transform_indices = @transform_2, window_bounds = array<i64: 16, 128>}, {pipeline_mode = #tpu.pipeline_mode<synchronous>, transform_indices = @transform_3, window_bounds = array<i64: 1, 128>}, {pipeline_mode = #tpu.pipeline_mode<synchronous>, transform_indices = @transform_4, window_bounds = array<i64: 128, 128>}, {pipeline_mode = #tpu.pipeline_mode<synchronous>, transform_indices = @transform_5, window_bounds = array<i64: 1, 128>}, {pipeline_mode = #tpu.pipeline_mode<synchronous>, transform_indices = @transform_6, window_bounds = array<i64: 128, 128>}, {pipeline_mode = #tpu.pipeline_mode<synchronous>, transform_indices = @transform_7, window_bounds = array<i64: 1, 128>}, {transform_indices = @transform_8, window_bounds = array<i64: 16, 8>}]} {
    %c0 = arith.constant 0 : index
    %c0_0 = arith.constant 0 : index
    %0 = vector.load %arg1[%c0, %c0_0] : memref<16x16xf32, #tpu.memory_space<vmem>>, vector<16x16xf32>
    %c0_1 = arith.constant 0 : index
    %c0_2 = arith.constant 0 : index
    %1 = vector.load %arg3[%c0_1, %c0_2] : memref<16x128xf32, #tpu.memory_space<vmem>>, vector<16x128xf32>
    %cst = arith.constant dense<0.000000e+00> : vector<16x128xf32>
    %2 = tpu.matmul %0, %1, %cst {dimension_numbers = #tpu.dot_dimension_numbers<[1], [0], [0], [1], [0, 0, 1, 1], [], []>} : vector<16x16xf32>, vector<16x128xf32>, vector<16x128xf32> -> vector<16x128xf32>
    %c0_3 = arith.constant 0 : index
    %c0_4 = arith.constant 0 : index
    %3 = vector.load %arg4[%c0_3, %c0_4] : memref<1x128xf32, #tpu.memory_space<vmem>>, vector<1x128xf32>
    %4 = vector.broadcast %3 : vector<1x128xf32> to vector<16x128xf32>
    %5 = arith.addf %2, %4 : vector<16x128xf32>
    %6 = math.tanh %5 : vector<16x128xf32>
    %c0_5 = arith.constant 0 : index
    %c0_6 = arith.constant 0 : index
    %7 = vector.load %arg5[%c0_5, %c0_6] : memref<128x128xf32, #tpu.memory_space<vmem>>, vector<128x128xf32>
    %cst_7 = arith.constant dense<0.000000e+00> : vector<16x128xf32>
    %8 = tpu.matmul %6, %7, %cst_7 {dimension_numbers = #tpu.dot_dimension_numbers<[1], [0], [0], [1], [0, 0, 1, 1], [], []>} : vector<16x128xf32>, vector<128x128xf32>, vector<16x128xf32> -> vector<16x128xf32>
    %c0_8 = arith.constant 0 : index
    %c0_9 = arith.constant 0 : index
    %9 = vector.load %arg6[%c0_8, %c0_9] : memref<1x128xf32, #tpu.memory_space<vmem>>, vector<1x128xf32>
    %10 = vector.broadcast %9 : vector<1x128xf32> to vector<16x128xf32>
    %11 = arith.addf %8, %10 : vector<16x128xf32>
    %12 = math.tanh %11 : vector<16x128xf32>
    %c0_10 = arith.constant 0 : index
    %c0_11 = arith.constant 0 : index
    %13 = vector.load %arg7[%c0_10, %c0_11] : memref<128x128xf32, #tpu.memory_space<vmem>>, vector<128x128xf32>
    %cst_12 = arith.constant dense<0.000000e+00> : vector<16x128xf32>
    %14 = tpu.matmul %12, %13, %cst_12 {dimension_numbers = #tpu.dot_dimension_numbers<[1], [0], [0], [1], [0, 0, 1, 1], [], []>} : vector<16x128xf32>, vector<128x128xf32>, vector<16x128xf32> -> vector<16x128xf32>
    %c0_13 = arith.constant 0 : index
    %c0_14 = arith.constant 0 : index
    %15 = vector.load %arg8[%c0_13, %c0_14] : memref<1x128xf32, #tpu.memory_space<vmem>>, vector<1x128xf32>
    %16 = vector.broadcast %15 : vector<1x128xf32> to vector<16x128xf32>
    %17 = arith.addf %14, %16 : vector<16x128xf32>
    %18 = tpu.iota {dimensions = array<i32: 1>} : vector<16x128xi32>
    %c8_i32 = arith.constant 8 : i32
    %19 = vector.broadcast %c8_i32 : i32 to vector<16x128xi32>
    %20 = arith.cmpi slt, %18, %19 : vector<16x128xi32>
    %cst_15 = arith.constant -1.000000e+30 : f32
    %21 = vector.broadcast %cst_15 : f32 to vector<16x128xf32>
    %22 = arith.select %20, %17, %21 : vector<16x128xi1>, vector<16x128xf32>
    %cst_16 = arith.constant dense<0xFF800000> : vector<16xf32>
    %23 = vector.multi_reduction <maximumf>, %22, %cst_16 [1] : vector<16x128xf32> to vector<16xf32>
    %24 = vector.shape_cast %23 : vector<16xf32> to vector<16x1xf32>
    %25 = vector.broadcast %24 : vector<16x1xf32> to vector<16x128xf32>
    %26 = arith.subf %22, %25 : vector<16x128xf32>
    %27 = math.exp %26 : vector<16x128xf32>
    %cst_17 = arith.constant dense<0.000000e+00> : vector<16xf32>
    %28 = vector.multi_reduction <add>, %27, %cst_17 [1] : vector<16x128xf32> to vector<16xf32>
    %29 = vector.shape_cast %28 : vector<16xf32> to vector<16x1xf32>
    %30 = math.log %29 : vector<16x1xf32>
    %31 = vector.broadcast %30 : vector<16x1xf32> to vector<16x128xf32>
    %32 = arith.subf %26, %31 : vector<16x128xf32>
    %c0_18 = arith.constant 0 : index
    %c0_19 = arith.constant 0 : index
    %33 = vector.load %arg2[%c0_18, %c0_19] : memref<16x1xi32, #tpu.memory_space<vmem>>, vector<16x1xi32>
    %34 = vector.broadcast %33 : vector<16x1xi32> to vector<16x128xi32>
    %35 = arith.cmpi eq, %18, %34 : vector<16x128xi32>
    %cst_20 = arith.constant 0.000000e+00 : f32
    %36 = vector.broadcast %cst_20 : f32 to vector<16x128xf32>
    %37 = arith.select %35, %32, %36 : vector<16x128xi1>, vector<16x128xf32>
    %cst_21 = arith.constant dense<0.000000e+00> : vector<16xf32>
    %38 = vector.multi_reduction <add>, %37, %cst_21 [1] : vector<16x128xf32> to vector<16xf32>
    %39 = vector.shape_cast %38 : vector<16xf32> to vector<16x1xf32>
    %40 = arith.mulf %27, %26 : vector<16x128xf32>
    %cst_22 = arith.constant 0.000000e+00 : f32
    %41 = vector.broadcast %cst_22 : f32 to vector<16x128xf32>
    %42 = arith.select %20, %40, %41 : vector<16x128xi1>, vector<16x128xf32>
    %cst_23 = arith.constant dense<0.000000e+00> : vector<16xf32>
    %43 = vector.multi_reduction <add>, %42, %cst_23 [1] : vector<16x128xf32> to vector<16xf32>
    %44 = vector.shape_cast %43 : vector<16xf32> to vector<16x1xf32>
    %45 = arith.divf %44, %29 : vector<16x1xf32>
    %46 = arith.subf %30, %45 : vector<16x1xf32>
    %47 = vector.extract_strided_slice %17 {offsets = [0, 8], sizes = [16, 1], strides = [1, 1]} : vector<16x128xf32> to vector<16x1xf32>
    %48 = tpu.iota {dimensions = array<i32: 1>} : vector<16x8xi32>
    %c0_i32 = arith.constant 0 : i32
    %49 = vector.broadcast %c0_i32 : i32 to vector<16x8xi32>
    %50 = arith.cmpi eq, %48, %49 : vector<16x8xi32>
    %c1_i32 = arith.constant 1 : i32
    %51 = vector.broadcast %c1_i32 : i32 to vector<16x8xi32>
    %52 = arith.cmpi eq, %48, %51 : vector<16x8xi32>
    %c2_i32 = arith.constant 2 : i32
    %53 = vector.broadcast %c2_i32 : i32 to vector<16x8xi32>
    %54 = arith.cmpi eq, %48, %53 : vector<16x8xi32>
    %cst_24 = arith.constant 0.000000e+00 : f32
    %55 = vector.shape_cast %46 : vector<16x1xf32> to vector<16x1xf32>
    %56 = vector.broadcast %55 : vector<16x1xf32> to vector<16x8xf32>
    %57 = vector.broadcast %cst_24 : f32 to vector<16x8xf32>
    %58 = arith.select %54, %56, %57 : vector<16x8xi1>, vector<16x8xf32>
    %59 = vector.shape_cast %47 : vector<16x1xf32> to vector<16x1xf32>
    %60 = vector.broadcast %59 : vector<16x1xf32> to vector<16x8xf32>
    %61 = arith.select %52, %60, %58 : vector<16x8xi1>, vector<16x8xf32>
    %62 = vector.shape_cast %39 : vector<16x1xf32> to vector<16x1xf32>
    %63 = vector.broadcast %62 : vector<16x1xf32> to vector<16x8xf32>
    %64 = arith.select %50, %63, %61 : vector<16x8xi1>, vector<16x8xf32>
    %c0_25 = arith.constant 0 : index
    %c0_26 = arith.constant 0 : index
    %65 = vector.load %arg9[%c0_25, %c0_26] : memref<16x8xf32, #tpu.memory_space<vmem>>, vector<16x8xf32>
    tpu.vector_store %arg9[%c0_25, %c0_26], %64 {strides = array<i32>} : memref<16x8xf32, #tpu.memory_space<vmem>>, vector<16x8xf32>,
    return
  }
  func.func @transform_0(%arg0: i32) -> (i32, i32) {
    %c0_i32 = arith.constant 0 : i32
    %c0_i32_0 = arith.constant 0 : i32
    return %arg0, %c0_i32 : i32, i32
  }
  func.func @transform_1(%arg0: i32) -> (i32, i32) {
    %c0_i32 = arith.constant 0 : i32
    %c0_i32_0 = arith.constant 0 : i32
    return %arg0, %c0_i32 : i32, i32
  }
  func.func @transform_2(%arg0: i32) -> (i32, i32) {
    %c0_i32 = arith.constant 0 : i32
    %c0_i32_0 = arith.constant 0 : i32
    %c0_i32_1 = arith.constant 0 : i32
    return %c0_i32, %c0_i32_0 : i32, i32
  }
  func.func @transform_3(%arg0: i32) -> (i32, i32) {
    %c0_i32 = arith.constant 0 : i32
    %c0_i32_0 = arith.constant 0 : i32
    %c0_i32_1 = arith.constant 0 : i32
    return %c0_i32, %c0_i32_0 : i32, i32
  }
  func.func @transform_4(%arg0: i32) -> (i32, i32) {
    %c0_i32 = arith.constant 0 : i32
    %c0_i32_0 = arith.constant 0 : i32
    %c0_i32_1 = arith.constant 0 : i32
    return %c0_i32, %c0_i32_0 : i32, i32
  }
  func.func @transform_5(%arg0: i32) -> (i32, i32) {
    %c0_i32 = arith.constant 0 : i32
    %c0_i32_0 = arith.constant 0 : i32
    %c0_i32_1 = arith.constant 0 : i32
    return %c0_i32, %c0_i32_0 : i32, i32
  }
  func.func @transform_6(%arg0: i32) -> (i32, i32) {
    %c0_i32 = arith.constant 0 : i32
    %c0_i32_0 = arith.constant 0 : i32
    %c0_i32_1 = arith.constant 0 : i32
    return %c0_i32, %c0_i32_0 : i32, i32
  }
  func.func @transform_7(%arg0: i32) -> (i32, i32) {
    %c0_i32 = arith.constant 0 : i32
    %c0_i32_0 = arith.constant 0 : i32
    %c0_i32_1 = arith.constant 0 : i32
    return %c0_i32, %c0_i32_0 : i32, i32
  }
  func.func @transform_8(%arg0: i32) -> (i32, i32) {
    %c0_i32 = arith.constant 0 : i32
    %c0_i32_0 = arith.constant 0 : i32
    return %arg0, %c0_i32 : i32, i32
  }
}

</mosaic_0001>

<bundles_post_ra>
// kernel: tpu_custom_call.1
= control target key start
LH: loop header
LB: loop body
LE: loop exit
PB: predicated region body
PF: predicated region fallthrough
CT: control target
= control target key end

     0   :  { %13 = vsyncpa [#allocation3], 0  ;;  %s769_s0 = inlined_call_operand.vmem [shape: f32[16,16], index: 0, kind: input, shape index: {}]   ;;  %s770_s1 = inlined_call_operand.vmem [shape: s32[16,1], index: 1, kind: input, shape index: {}]   ;;  %s771_s2 = inlined_call_operand.hbm [shape: f32[16,128], index: 2, kind: input, shape index: {}]   ;;  %s772_s3 = inlined_call_operand.vmem [shape: f32[1,128], index: 3, kind: input, shape index: {}]   ;;  %s773_s4 = inlined_call_operand.hbm [shape: f32[128,128], index: 4, kind: input, shape index: {}]   ;;  %s774_s5 = inlined_call_operand.vmem [shape: f32[1,128], index: 5, kind: input, shape index: {}]   ;;  %s775_s6 = inlined_call_operand.hbm [shape: f32[128,128], index: 6, kind: input, shape index: {}]   ;;  %s776_s7 = inlined_call_operand.vmem [shape: f32[1,128], index: 7, kind: input, shape index: {}]   ;;  %s777_s8 = inlined_call_operand.vmem [shape: f32[16,8], index: 8, kind: output, shape index: {}]  }
   0x1   :  { %14 = vsyncpa [#allocation5], 0  ;;  %s663_s27 = smov [#allocation4]   ;;  %s664_s29 = smov [#allocation2]  }
   0x2   :  { %s38_s28 = sshll.u32 %s663_s27, 4  ;;  %s24_s30 = sshll.u32 %s664_s29, 4  ;;  %s39_s28 = int_to_ptr.vmem [resolvable:$true] %s38_s28  ;;  %s25_s30 = int_to_ptr.vmem [resolvable:$true] %s24_s30 }
   0x3   :  { %s607_s9 = scalar_lea.vmem %s39_s28, 2048  ;;  %p612_p1 = scmp.lt.s32.totalorder %s39_s28, %s39_s28 }
   0x4   :  { %p608_p0 = scmp.ne.s32.totalorder %s39_s28, %s607_s9  ;;  %p613_p2 = scmp.lt.s32.totalorder %s607_s9, %s607_s9 }
   0x6   :  { %p614_p3 = por %p613_p2, %p612_p1 }
   0x8   :  { %p615_p4 = pnand %p614_p3, %p608_p0 }
   0xa   :  { %618 = shalt.err (!%p615_p4)
}
   0xb   :  { %s665_s10 = smov 128   ;;  %s666_s11 = smov 8  }
   0xc   :  { %44 = dma.hbm_to_vmem [thread:$0]  %s773_s4, 2048, %s39_s28, [#allocation5], %s665_s10, %s665_s10, %s666_s11  }
   0xd   :  { %s627_s14 = scalar_lea.vmem %s25_s30, 256  ;;  %p632_p6 = scmp.lt.s32.totalorder %s25_s30, %s25_s30 }
   0xe   :  { %p628_p5 = scmp.ne.s32.totalorder %s25_s30, %s627_s14  ;;  %p633_p7 = scmp.lt.s32.totalorder %s627_s14, %s627_s14 }
  0x10   :  { %p634_p8 = por %p633_p7, %p632_p6 }
  0x12   :  { %p635_p9 = pnand %p634_p8, %p628_p5 }
  0x14   :  { %638 = shalt.err (!%p635_p9)
}
  0x15   :  { %30 = dma.hbm_to_vmem [thread:$0]  %s771_s2, 256, %s25_s30, [#allocation3], %s665_s10, %s665_s10, %s666_s11  }
  0x16   :  { %s667_s17 = smov [#allocation6]  }
  0x17   :  { %s52_s18 = sshll.u32 %s667_s17, 4  ;;  %s53_s18 = int_to_ptr.vmem [resolvable:$true] %s52_s18 }
  0x18   :  { %s647_s19 = scalar_lea.vmem %s53_s18, 2048  ;;  %p652_p11 = scmp.lt.s32.totalorder %s53_s18, %s53_s18 }
  0x19   :  { %p648_p10 = scmp.ne.s32.totalorder %s53_s18, %s647_s19  ;;  %p653_p12 = scmp.lt.s32.totalorder %s647_s19, %s647_s19 }
  0x1b   :  { %p654_p13 = por %p653_p12, %p652_p11 }
  0x1d   :  { %p655_p0 = pnand %p654_p13, %p648_p10 }
  0x1f   :  { %658 = shalt.err (!%p655_p0)
}
  0x20   :  { %58 = dma.hbm_to_vmem [thread:$0]  %s775_s6, 2048, %s53_s18, [#allocation5], %s665_s10, %s665_s10, %s666_s11  }
  0x21   :  { %659 = dma.done.wait [#allocation3], 256  }
  0x22   :  { %660 = vsyncadd [#allocation3], 4294967040 }
  0x23   :  { %661 = dma.done.wait [#allocation5], 4096  }
  0x24   :  { %662 = vsyncadd [#allocation5], 4294963200  ;;  %vm81_vm0 = vcmask 130048   ;;  %v73_v0 = vld [vmem:[#allocation2 + $0x8] sm:$0xff]  ;;  %v72_v1 = vld [vmem:[#allocation2] sm:$0xff]  ;;  %v668_v50 = vmov 0   ;;  %v363_v51 = vlaneseq }
  0x25   :  { %v70_v2 = vld [vmem:[%s769_s0] sm:$0xff]  ;;  %491 = vmatprep.subr.mxu0 %v73_v0  ;;  %v180_v3 = vld [vmem:[#allocation4 + $0x78] sm:$0xff]  ;;  %v178_v6 = vld [vmem:[#allocation4 + $0x68] sm:$0xff]  ;;  %575 = vset.pattern.permute.xlu0 %v668_v50  ;;  %v669_v61 = vmov 8   ;;  %vm437_vm7 = vcmask 64512  }
  0x26   :  { %495 = vmatprep.mubr.msk.f32.mxu0 %vm81_vm0, %v70_v2  ;;  %v179_v4 = vld [vmem:[#allocation4 + $0x70] sm:$0xff]  ;;  %492 = vmatpush3.msra.mxu0 %v73_v0  ;;  %v71_v5 = vld [vmem:[%s769_s0 + $0x8] sm:$0xff]  ;;  %v177_v7 = vld [vmem:[#allocation4 + $0x60] sm:$0xff]  ;;  %v738_v53 = vand.u32 127, %v363_v51 }
  0x27   :  { %498 = vmatprep.subr.mxu1 %v180_v3  ;;  %493 = vmatprep.subr.mxu0 %v72_v1  ;;  %v176_v8 = vld [vmem:[#allocation4 + $0x58] sm:$0xff]  ;;  %v175_v9 = vld [vmem:[#allocation4 + $0x50] sm:$0xff]  ;;  %v174_v10 = vld [vmem:[#allocation4 + $0x48] sm:$0xff] }
  0x28   :  { %499 = vmatpush3.msra.mxu1 %v180_v3  ;;  %494 = vmatpush3.msra.mxu0 %v72_v1  ;;  %v173_v11 = vld [vmem:[#allocation4 + $0x40] sm:$0xff]  ;;  %v172_v12 = vld [vmem:[#allocation4 + $0x38] sm:$0xff]  ;;  %v171_v13 = vld [vmem:[#allocation4 + $0x30] sm:$0xff]  ;;  %vm365_vm1 = vcmp.lt.s32.totalorder %v738_v53, 8  ;;  %vm420_vm4 = vcmp.eq.s32.totalorder %v738_v53, 2  ;;  %vm419_vm5 = vcmp.eq.s32.totalorder %v738_v53, 1 }
  0x29   :  { %500 = vmatprep.subr.mxu1 %v179_v4  ;;  %496 = vmatmul.mubr.msk.f32.vlgmr.msra.gmra.mxu0 %vm81_vm0, %v71_v5  ;;  %v170_v14 = vld [vmem:[#allocation4 + $0x28] sm:$0xff]  ;;  %v169_v15 = vld [vmem:[#allocation4 + $0x20] sm:$0xff]  ;;  %v168_v16 = vld [vmem:[#allocation4 + $0x18] sm:$0xff]  ;;  %vm418_vm6 = vcmp.eq.s32.totalorder %v738_v53, 0 }
  0x2a   :  { %501 = vmatpush3.msra.mxu1 %v179_v4  ;;  %v167_v17 = vld [vmem:[#allocation4 + $0x10] sm:$0xff]  ;;  %v166_v18 = vld [vmem:[#allocation4 + $0x8] sm:$0xff]  ;;  %v165_v19 = vld [vmem:[#allocation4] sm:$0xff]  ;;  %576 = vset.pattern.permute.xlu1 %v668_v50 }
  0x2b   :  { %502 = vmatprep.subr.mxu1 %v178_v6  ;;  %v280_v20 = vld [vmem:[#allocation6 + $0x78] sm:$0xff]  ;;  %v279_v21 = vld [vmem:[#allocation6 + $0x70] sm:$0xff]  ;;  %v278_v22 = vld [vmem:[#allocation6 + $0x68] sm:$0xff] }
  0x2c   :  { %503 = vmatpush3.msra.mxu1 %v178_v6  ;;  %533 = vmatprep.subr.mxu0 %v280_v20  ;;  %v277_v23 = vld [vmem:[#allocation6 + $0x60] sm:$0xff]  ;;  %v276_v24 = vld [vmem:[#allocation6 + $0x58] sm:$0xff]  ;;  %v275_v25 = vld [vmem:[#allocation6 + $0x50] sm:$0xff] }
  0x2d   :  { %504 = vmatprep.subr.mxu1 %v177_v7  ;;  %534 = vmatpush3.msra.mxu0 %v280_v20  ;;  %v446_v26 = vld [vmem:[%s772_s3] ss:$0 sm:$0xff]  ;;  %v274_v33 = vld [vmem:[#allocation6 + $0x48] sm:$0xff]  ;;  %v273_v34 = vld [vmem:[#allocation6 + $0x40] sm:$0xff] }
  0x2e   :  { %505 = vmatpush3.msra.mxu1 %v177_v7  ;;  %535 = vmatprep.subr.mxu0 %v279_v21  ;;  %v272_v35 = vld [vmem:[#allocation6 + $0x38] sm:$0xff]  ;;  %v271_v36 = vld [vmem:[#allocation6 + $0x30] sm:$0xff]  ;;  %v270_v37 = vld [vmem:[#allocation6 + $0x28] sm:$0xff] }
  0x2f   :  { %506 = vmatprep.subr.mxu1 %v176_v8  ;;  %536 = vmatpush3.msra.mxu0 %v279_v21  ;;  %v269_v38 = vld [vmem:[#allocation6 + $0x20] sm:$0xff]  ;;  %v268_v39 = vld [vmem:[#allocation6 + $0x18] sm:$0xff]  ;;  %v267_v40 = vld [vmem:[#allocation6 + $0x10] sm:$0xff] }
  0x30   :  { %507 = vmatpush3.msra.mxu1 %v176_v8  ;;  %537 = vmatprep.subr.mxu0 %v278_v22  ;;  %v266_v41 = vld [vmem:[#allocation6 + $0x8] sm:$0xff]  ;;  %v265_v42 = vld [vmem:[#allocation6] sm:$0xff]  ;;  %v449_v43 = vld [vmem:[%s774_s5] ss:$0 sm:$0xff] }
  0x31   :  { %508 = vmatprep.subr.mxu1 %v175_v9  ;;  %538 = vmatpush3.msra.mxu0 %v278_v22  ;;  %v450_v54 = vld [vmem:[%s776_s7] ss:$0 sm:$0xff]  ;;  %v389_v8 = vld [vmem:[%s770_s1 + $0x8] sm:$0xff] }
  0x32   :  { %509 = vmatpush3.msra.mxu1 %v175_v9  ;;  %539 = vmatprep.subr.mxu0 %v277_v23  ;;  %v388_v60 = vld [vmem:[%s770_s1] sm:$0xff] }
  0x33   :  { %510 = vmatprep.subr.mxu1 %v174_v10  ;;  %540 = vmatpush3.msra.mxu0 %v277_v23 }
  0x34   :  { %511 = vmatpush3.msra.mxu1 %v174_v10  ;;  %541 = vmatprep.subr.mxu0 %v276_v24 }
  0x35   :  { %512 = vmatprep.subr.mxu1 %v173_v11  ;;  %542 = vmatpush3.msra.mxu0 %v276_v24 }
  0x36   :  { %513 = vmatpush3.msra.mxu1 %v173_v11  ;;  %543 = vmatprep.subr.mxu0 %v275_v25 }
  0x37   :  { %514 = vmatprep.subr.mxu1 %v172_v12  ;;  %544 = vmatpush3.msra.mxu0 %v275_v25 }
  0x38   :  { %515 = vmatpush3.msra.mxu1 %v172_v12  ;;  %545 = vmatprep.subr.mxu0 %v274_v33 }
  0x39   :  { %516 = vmatprep.subr.mxu1 %v171_v13  ;;  %546 = vmatpush3.msra.mxu0 %v274_v33 }
  0x3a   :  { %517 = vmatpush3.msra.mxu1 %v171_v13  ;;  %547 = vmatprep.subr.mxu0 %v273_v34 }
  0x3b   :  { %518 = vmatprep.subr.mxu1 %v170_v14  ;;  %548 = vmatpush3.msra.mxu0 %v273_v34 }
  0x3c   :  { %519 = vmatpush3.msra.mxu1 %v170_v14  ;;  %549 = vmatprep.subr.mxu0 %v272_v35 }
  0x3d   :  { %520 = vmatprep.subr.mxu1 %v169_v15  ;;  %550 = vmatpush3.msra.mxu0 %v272_v35 }
  0x3e   :  { %521 = vmatpush3.msra.mxu1 %v169_v15  ;;  %551 = vmatprep.subr.mxu0 %v271_v36 }
  0x3f   :  { %522 = vmatprep.subr.mxu1 %v168_v16  ;;  %552 = vmatpush3.msra.mxu0 %v271_v36 }
  0x40   :  { %523 = vmatpush3.msra.mxu1 %v168_v16  ;;  %553 = vmatprep.subr.mxu0 %v270_v37 }
  0x41   :  { %524 = vmatprep.subr.mxu1 %v167_v17  ;;  %554 = vmatpush3.msra.mxu0 %v270_v37 }
  0x42   :  { %525 = vmatpush3.msra.mxu1 %v167_v17  ;;  %555 = vmatprep.subr.mxu0 %v269_v38 }
  0x43   :  { %526 = vmatprep.subr.mxu1 %v166_v18  ;;  %556 = vmatpush3.msra.mxu0 %v269_v38 }
  0x44   :  { %527 = vmatpush3.msra.mxu1 %v166_v18  ;;  %557 = vmatprep.subr.mxu0 %v268_v39 }
  0x45   :  { %528 = vmatprep.subr.mxu1 %v165_v19  ;;  %558 = vmatpush3.msra.mxu0 %v268_v39 }
  0x46   :  { %529 = vmatpush3.msra.mxu1 %v165_v19  ;;  %559 = vmatprep.subr.mxu0 %v267_v40 }
  0x47   :  { %560 = vmatpush3.msra.mxu0 %v267_v40 }
  0x48   :  { %561 = vmatprep.subr.mxu0 %v266_v41 }
  0x49   :  { %562 = vmatpush3.msra.mxu0 %v266_v41 }
  0x4a   :  { %563 = vmatprep.subr.mxu0 %v265_v42 }
  0x4b   :  { %564 = vmatpush3.msra.mxu0 %v265_v42 }
  0xe9   :  { %v497_v27 = vpop.f32.mrf.mxu0 }
  0xea   :  { %v160_v28 = vadd.f32 %v497_v27, %v446_v26 }
  0xeb   :  { %v154_v29 = vpop.f32.mrf.mxu0 }
  0xec   :  { %v155_v30 = vadd.f32 %v446_v26, %v154_v29 }
  0xee   :  { %579 = vtanh.f32 %v155_v30 }
  0xef   :  { %581 = vtanh.f32 %v160_v28 }
  0xfb   :  { %v580_v31 = vpop.eup %579 }
  0xfc   :  { %v582_v32 = vpop.eup %581  ;;  %530 = vmatprep.mubr.f32.mxu1 %v580_v31 }
  0xfd   :  { %531 = vmatmul.mubr.f32.vlgmr.msra.gmra.mxu1 %v582_v32 }
 0x1bd   :  { %v532_v44 = vpop.f32.mrf.mxu1 }
 0x1be   :  { %v260_v45 = vadd.f32 %v532_v44, %v449_v43 }
 0x1bf   :  { %v254_v46 = vpop.f32.mrf.mxu1 }
 0x1c0   :  { %v255_v47 = vadd.f32 %v449_v43, %v254_v46 }
 0x1c2   :  { %583 = vtanh.f32 %v255_v47 }
 0x1c3   :  { %585 = vtanh.f32 %v260_v45 }
 0x1cf   :  { %v584_v48 = vpop.eup %583 }
 0x1d0   :  { %v586_v49 = vpop.eup %585  ;;  %565 = vmatprep.mubr.f32.mxu0 %v584_v48 }
 0x1d1   :  { %566 = vmatmul.mubr.f32.vlgmr.msra.gmra.mxu0 %v586_v49 }
 0x291   :  { %v567_v52 = vpop.f32.mrf.mxu0 }
 0x292   :  { %v360_v57 = vadd.f32 %v567_v52, %v450_v54 }
 0x293   :  { %v354_v55 = vpop.f32.mrf.mxu0 }
 0x294   :  { %v355_v56 = vadd.f32 %v450_v54, %v354_v55  ;;  %v367_v59 = vsel %vm365_vm1, %v360_v57, -1e+30 }
 0x296   :  { %v366_v58 = vsel %vm365_vm1, %v355_v56, -1e+30 }
 0x297   :  { %368 = vmax.xlane.f32.xlu0 %v366_v58 }
 0x29b   :  { %370 = vmax.xlane.f32.xlu0 %v367_v59 }
 0x2b1   :  { %391 = vperm.xlu0 %575, %v388_v60  }
 0x2b5   :  { %578 = vset.pattern.permute.xlu0 %v669_v61 }
 0x320   :  { %v369_v62 = vpop.xlane.xlu0 %368 }
 0x321   :  { %v372_v0 = vsub.f32 %v366_v58, %v369_v62 }
 0x323   :  { %v374_v3 = vmul.f32 1.442695, %v372_v0 }
 0x324   :  { %v371_v63 = vpop.xlane.xlu0 %370 }
 0x325   :  { %v373_v1 = vsub.f32 %v367_v59, %v371_v63 }
 0x327   :  { %v376_v2 = vmul.f32 1.442695, %v373_v1 }
 0x329   :  { %587 = vpow2.f32 %v376_v2 }
 0x32a   :  { %589 = vpow2.f32 %v374_v3 }
 0x32c   :  { %v392_v13 = vpop.permute.xlu0 %391 }
 0x32d   :  { %vm396_vm3 = vcmp.eq.s32.totalorder %v738_v53, %v392_v13 }
 0x336   :  { %v588_v4 = vpop.eup %587 }
 0x337   :  { %380 = vadd.xlane.f32.xlu1 %v588_v4  ;;  %v405_v5 = vmul.f32 %v588_v4, %v373_v1  ;;  %v590_v7 = vpop.eup %589 }
 0x338   :  { %v404_v9 = vmul.f32 %v590_v7, %v372_v0 }
 0x339   :  { %v407_v6 = vsel %vm365_vm1, %v405_v5, 0.0 }
 0x33a   :  { %410 = vadd.xlane.f32.xlu0 %v407_v6  ;;  %v406_v10 = vsel %vm365_vm1, %v404_v9, 0.0 }
 0x33b   :  { %378 = vadd.xlane.f32.xlu1 %v590_v7 }
 0x34c   :  { %394 = vperm.xlu1 %576, %v389_v8  }
 0x350   :  { %430 = vperm.xlu0 %578, %v360_v57   ;;  %577 = vset.pattern.permute.xlu1 %v669_v61 }
 0x370   :  { %408 = vadd.xlane.f32.xlu1 %v406_v10 }
 0x3c0   :  { %v381_v11 = vpop.xlane.xlu1 %380 }
 0x3c1   :  { %591 = vlog2.f32 %v381_v11 }
 0x3c2   :  { %593 = vrcp.f32 %v381_v11 }
 0x3c3   :  { %v411_v18 = vpop.xlane.xlu0 %410 }
 0x3c4   :  { %v379_v12 = vpop.xlane.xlu1 %378 }
 0x3c5   :  { %595 = vlog2.f32 %v379_v12 }
 0x3c6   :  { %597 = vrcp.f32 %v379_v12 }
 0x3c8   :  { %v395_v14 = vpop.permute.xlu1 %394 }
 0x3c9   :  { %vm397_vm2 = vcmp.eq.s32.totalorder %v738_v53, %v395_v14 }
 0x3cb   :  { %v431_v32 = vpop.permute.xlu0 %430 }
 0x3ce   :  { %v592_v15 = vpop.eup %591 }
 0x3cf   :  { %v594_v16 = vpop.eup %593  ;;  %v385_v17 = vmul.f32 0.6931472, %v592_v15 }
 0x3d0   :  { %v415_v19 = vmul.f32 %v594_v16, %v411_v18 }
 0x3d1   :  { %v387_v20 = vsub.f32 %v373_v1, %v385_v17 }
 0x3d2   :  { %v596_v21 = vpop.eup %595  ;;  %v417_v22 = vsub.f32 %v385_v17, %v415_v19 }
 0x3d3   :  { %v399_v23 = vsel %vm397_vm2, %v387_v20, 0.0  ;;  %v383_v24 = vmul.f32 0.6931472, %v596_v21  ;;  %v598_v27 = vpop.eup %597 }
 0x3d4   :  { %402 = vadd.xlane.f32.xlu1 %v399_v23  ;;  %v422_v31 = vsel %vm420_vm4, %v417_v22, 0.0 }
 0x3d5   :  { %v386_v25 = vsub.f32 %v372_v0, %v383_v24  ;;  %v434_v33 = vsel %vm419_vm5, %v431_v32, %v422_v31 }
 0x3d7   :  { %v398_v26 = vsel %vm396_vm3, %v386_v25, 0.0 }
 0x3d8   :  { %400 = vadd.xlane.f32.xlu1 %v398_v26 }
 0x3e9   :  { %425 = vperm.xlu1 %577, %v355_v56  }
 0x3f9   :  { %v409_v28 = vpop.xlane.xlu1 %408 }
 0x3fa   :  { %v413_v29 = vmul.f32 %v598_v27, %v409_v28 }
 0x3fc   :  { %v416_v30 = vsub.f32 %v383_v24, %v413_v29 }
 0x3fe   :  { %v421_v37 = vsel %vm420_vm4, %v416_v30, 0.0 }
 0x45d   :  { %v403_v34 = vpop.xlane.xlu1 %402 }
 0x45e   :  { %v436_v35 = vsel %vm418_vm6, %v403_v34, %v434_v33 }
 0x45f   :  { %439 = vst.msk [vmem:[%s777_s8 + $0x8] sm:$0xff] %vm437_vm7, %v436_v35 }
 0x461   :  { %v401_v36 = vpop.xlane.xlu1 %400 }
 0x465   :  { %v426_v38 = vpop.permute.xlu1 %425 }
 0x466   :  { %v433_v39 = vsel %vm419_vm5, %v426_v38, %v421_v37 }
 0x467   :  { %v435_v40 = vsel %vm418_vm6, %v401_v36, %v433_v39 }
 0x468   :  { %438 = vst.msk [vmem:[%s777_s8] sm:$0xff] %vm437_vm7, %v435_v40 }
 0x469   :  { %444 = vsyncpa [#allocation3], 1 }
 0x46a   :  { %445 = vsyncpa [#allocation5], 1 }

</bundles_post_ra>
